<compile_context>
chip_gen: v5e
topology: v5e:2x2
jax: 0.10.0
libtpu: 0.0.40
codegen_flags: <defaults>
</compile_context>

<pallas_src>
import functools

import jax
import jax.numpy as jnp
import numpy as np
from jax import lax
from jax.experimental import pallas as pl
from jax.experimental.pallas import tpu as pltpu

VOCAB = 32        # len(vocab)
HIDDEN = 32       # num_hiddens
NUM_LAYERS = 2    # num_layers
BATCH = 2
SEQ = 8
VPAD = 128        # lane-dense head width (vocab zero-padded to one full 128-lane tile)


def rnn_kernel(state_ref,          # (2, batch, H)   initial hidden state
               add_ref,            # ((seq+1)*batch, 2H)  [x_emb + b0 | b1] add slab
               w_ref,              # (2H, 2H)        [[Whh0, Wxh1], [0, Whh1]]
               wo_ref,             # (H, VPAD)       head weight (zero-padded lanes)
               bo_ref,             # (1, VPAD)       head bias   (zero-padded lanes)
               out_ref,            # (seq*batch, VPAD) logits (padded)
               hn_ref,             # (2, batch, H)   final hidden state
               y_ref,              # VMEM scratch: (seq*batch, H) top-layer outputs
               *, seq, batch, hidden):
    H = hidden
    w = w_ref[...]                                       # resident (2H, 2H)

    s0 = state_ref[0]                                    # h0[-1]
    s1 = state_ref[1]                                    # h1[-1]
    carry0 = jnp.concatenate([s0, s1], axis=-1)          # (batch, 2H); off critical path
    left = lax.broadcasted_iota(jnp.int32, (batch, 2 * H), 1) < H

    # carry entering step s is [h0[s-1], h1[s-2]]; step output is [h0[s], h1[s-1]].
    carry = carry0
    h0_last = s0
    for s in range(seq + 1):                             # fully unrolled wavefront
        z = jnp.dot(carry, w, preferred_element_type=jnp.float32)
        out = jnp.tanh(z + add_ref[pl.ds(s * batch, batch), :])   # [h0[s], h1[s-1]]
        if s == 0:
            # layer-1 half of step 0 is "t = -1" garbage; splice the real h1[-1] back
            # in with a single vsel (mask precomputed, no lane movement on the chain).
            carry = jnp.where(left, out, carry0)
        else:
            y_ref[pl.ds((s - 1) * batch, batch), :] = out[:, H:]  # Y[t=s-1] = h1[s-1]
            carry = out
        if s == seq - 1:
            h0_last = out[:, :H]                         # h0[seq-1]

    # Final hidden state, written exactly once.
    hn_ref[0] = h0_last
    hn_ref[1] = carry[:, H:]                             # h1[seq-1]

    # Linear head applied once to the whole (seq*batch, H) slab; lane-dense store.
    out_ref[...] = (jnp.dot(y_ref[...], wo_ref[...],
                            preferred_element_type=jnp.float32)
                    + bo_ref[...])


@jax.jit
def rnn_model_forward(inputs, state, params):
    """inputs: (batch, seq) int32 token ids; state: (num_layers, batch, hidden) f32."""
    (wxh0, whh0, b0, wxh1, whh1, b1, wo, bo) = params

    batch, seq = inputs.shape
    n_layers, _, hidden = state.shape
    vocab = wxh0.shape[0]
    H = hidden

    # --- hoisted out of the recurrence (wrapper-side prep, runs once per call) -----
    # one_hot(x) @ Wxh0 is just a row gather; fold b0 in. Append one dummy time step
    # for the last wavefront step (its layer-0 half is discarded).
    tok = inputs.T.reshape(-1)                                    # (seq*batch,) time-major
    x_emb = wxh0[tok] + b0                                        # (seq*batch, H)
    x_emb = jnp.concatenate(
        [x_emb, jnp.zeros((batch, H), x_emb.dtype)], axis=0)      # ((seq+1)*batch, H)
    b1_slab = jnp.broadcast_to(b1.reshape(1, H), ((seq + 1) * batch, H))
    add = jnp.concatenate([x_emb, b1_slab], axis=-1)              # ((seq+1)*batch, 2H)

    # Wavefront weight: [h0[s-1], h1[s-2]] @ W_stack -> [h0[s] pre-act (minus x,b0),
    #                                                    h1[s-1] pre-act (minus b1)]
    w_stack = jnp.block([[whh0, wxh1],
                         [jnp.zeros((H, H), whh0.dtype), whh1]])  # (2H, 2H)

    # Lane-dense head: pad vocab -> VPAD lanes; sliced back after the call.
    wo_pad = jnp.zeros((H, VPAD), wo.dtype).at[:, :vocab].set(wo)
    bo_pad = jnp.zeros((1, VPAD), bo.dtype).at[:, :vocab].set(bo.reshape(1, vocab))

    kernel = functools.partial(rnn_kernel, seq=seq, batch=batch, hidden=hidden)

    logits_pad, h_n = pl.pallas_call(
        kernel,
        out_shape=(
            jax.ShapeDtypeStruct((seq * batch, VPAD), jnp.float32),
            jax.ShapeDtypeStruct((n_layers, batch, hidden), jnp.float32),
        ),
        grid=(1,),                                                # single invocation
        in_specs=[
            pl.BlockSpec((n_layers, batch, hidden), lambda i: (0, 0, 0)),    # state
            pl.BlockSpec(((seq + 1) * batch, 2 * hidden), lambda i: (0, 0)), # add slab
            pl.BlockSpec((2 * hidden, 2 * hidden), lambda i: (0, 0)),        # W_stack
            pl.BlockSpec((hidden, VPAD), lambda i: (0, 0)),                  # Wo (pad)
            pl.BlockSpec((1, VPAD), lambda i: (0, 0)),                       # bo (pad)
        ],
        out_specs=(
            pl.BlockSpec((seq * batch, VPAD), lambda i: (0, 0)),             # logits
            pl.BlockSpec((n_layers, batch, hidden), lambda i: (0, 0, 0)),    # h_n
        ),
        scratch_shapes=[pltpu.VMEM((seq * batch, hidden), jnp.float32)],
        compiler_params=pltpu.CompilerParams(
            dimension_semantics=("arbitrary",)),
        # TODO(synk): on v7x the batch rows could be split across the two TensorCores
        # (grid=(batch,), "parallel"); at batch=2/seq=8 per-core fixed overhead likely
        # dominates, so the single-invocation form is kept for all generations.
    )(state, add, w_stack, wo_pad, bo_pad)

    # Matches PyTorch: output = linear(Y.reshape(-1, hidden)) -> (seq*batch, vocab)
    return logits_pad[:, :vocab], h_n


def reference_forward(inputs, state, params):
    """Pure-JAX reference mirroring PyTorch nn.RNN(tanh, 2 layers) + Linear semantics."""
    (wxh0, whh0, b0, wxh1, whh1, b1, wo, bo) = params
    X = jax.nn.one_hot(inputs.T, VOCAB, dtype=jnp.float32)        # (seq, batch, vocab)

    def step(h, x_t):
        h0 = jnp.tanh(x_t @ wxh0 + h[0] @ whh0 + b0)
        h1 = jnp.tanh(h0 @ wxh1 + h[1] @ whh1 + b1)
        return jnp.stack([h0, h1]), h1

    h_n, Y = lax.scan(step, state, X)
    out = Y.reshape(-1, HIDDEN) @ wo + bo
    return out, h_n


def init_params(key):
    """Deterministic init (uniform(-1/sqrt(H), 1/sqrt(H)) like PyTorch nn.RNN/Linear)."""
    bound = 1.0 / np.sqrt(HIDDEN)
    ks = jax.random.split(key, 8)
    u = lambda k, shape: jax.random.uniform(k, shape, jnp.float32, -bound, bound)
    wxh0 = u(ks[0], (VOCAB, HIDDEN))    # W_ih_l0.T
    whh0 = u(ks[1], (HIDDEN, HIDDEN))   # W_hh_l0.T
    b0 = u(ks[2], (1, HIDDEN))          # b_ih_l0 + b_hh_l0 (combined)
    wxh1 = u(ks[3], (HIDDEN, HIDDEN))   # W_ih_l1.T
    whh1 = u(ks[4], (HIDDEN, HIDDEN))   # W_hh_l1.T
    b1 = u(ks[5], (1, HIDDEN))
    wo = u(ks[6], (HIDDEN, VOCAB))      # linear.weight.T
    bo = u(ks[7], (1, VOCAB))           # linear.bias
    return (wxh0, whh0, b0, wxh1, whh1, b1, wo, bo)


if __name__ == "__main__":
    key = jax.random.PRNGKey(0)
    k_params, k_inp = jax.random.split(key)
    params = init_params(k_params)

    inputs = jax.random.randint(k_inp, (BATCH, SEQ), 0, VOCAB, dtype=jnp.int32)
    # begin_state: zeros of shape (num_directions * num_layers, batch, hidden)
    state = jnp.zeros((NUM_LAYERS, BATCH, HIDDEN), jnp.float32)

    out, h_n = rnn_model_forward(inputs, state, params)
    jax.block_until_ready((out, h_n))

    ref_out, ref_h = reference_forward(inputs, state, params)
    assert out.shape == (SEQ * BATCH, VOCAB)
    assert h_n.shape == (NUM_LAYERS, BATCH, HIDDEN)
    np.testing.assert_allclose(np.asarray(out), np.asarray(ref_out), rtol=1e-3, atol=1e-3)
    np.testing.assert_allclose(np.asarray(h_n), np.asarray(ref_h), rtol=1e-3, atol=1e-3)

    print("KERNEL_OK")
</pallas_src>

<mosaic_0001>
module attributes {stable_mosaic.version = 11 : i64} {
  func.func @rnn_kernel(%arg0: i32, %arg1: memref<2x2x32xf32, #tpu.memory_space<vmem>>, %arg2: memref<18x64xf32, #tpu.memory_space<vmem>>, %arg3: memref<64x64xf32, #tpu.memory_space<vmem>>, %arg4: memref<32x128xf32, #tpu.memory_space<vmem>>, %arg5: memref<1x128xf32, #tpu.memory_space<vmem>>, %arg6: memref<16x128xf32, #tpu.memory_space<vmem>>, %arg7: memref<2x2x32xf32, #tpu.memory_space<vmem>>, %arg8: memref<16x32xf32, #tpu.memory_space<vmem>>) attributes {dimension_semantics = [#tpu.dimension_semantics<arbitrary>], iteration_bounds = array<i64: 1>, scalar_prefetch = 0 : i64, scratch_operands = 1 : i64, tpu.core_type = #tpu.core_type<tc>, window_params = [{pipeline_mode = #tpu.pipeline_mode<synchronous>, transform_indices = @transform_0, window_bounds = array<i64: 2, 2, 32>}, {pipeline_mode = #tpu.pipeline_mode<synchronous>, transform_indices = @transform_1, window_bounds = array<i64: 18, 64>}, {pipeline_mode = #tpu.pipeline_mode<synchronous>, transform_indices = @transform_2, window_bounds = array<i64: 64, 64>}, {pipeline_mode = #tpu.pipeline_mode<synchronous>, transform_indices = @transform_3, window_bounds = array<i64: 32, 128>}, {pipeline_mode = #tpu.pipeline_mode<synchronous>, transform_indices = @transform_4, window_bounds = array<i64: 1, 128>}, {pipeline_mode = #tpu.pipeline_mode<synchronous>, transform_indices = @transform_5, window_bounds = array<i64: 16, 128>}, {pipeline_mode = #tpu.pipeline_mode<synchronous>, transform_indices = @transform_6, window_bounds = array<i64: 2, 2, 32>}]} {
    %c0 = arith.constant 0 : index
    %c0_0 = arith.constant 0 : index
    %0 = vector.load %arg3[%c0, %c0_0] : memref<64x64xf32, #tpu.memory_space<vmem>>, vector<64x64xf32>
    %c0_1 = arith.constant 0 : index
    %c0_2 = arith.constant 0 : index
    %c0_3 = arith.constant 0 : index
    %1 = vector.load %arg1[%c0_1, %c0_2, %c0_3] : memref<2x2x32xf32, #tpu.memory_space<vmem>>, vector<1x2x32xf32>
    %2 = vector.shape_cast %1 : vector<1x2x32xf32> to vector<2x32xf32>
    %c1 = arith.constant 1 : index
    %c0_4 = arith.constant 0 : index
    %c0_5 = arith.constant 0 : index
    %3 = vector.load %arg1[%c1, %c0_4, %c0_5] : memref<2x2x32xf32, #tpu.memory_space<vmem>>, vector<1x2x32xf32>
    %4 = vector.shape_cast %3 : vector<1x2x32xf32> to vector<2x32xf32>
    %5 = tpu.concatenate %2, %4 in 1 : vector<2x32xf32>, vector<2x32xf32> -> vector<2x64xf32>
    %6 = tpu.iota {dimensions = array<i32: 1>} : vector<2x64xi32>
    %c32_i32 = arith.constant 32 : i32
    %7 = vector.broadcast %c32_i32 : i32 to vector<2x64xi32>
    %8 = arith.cmpi slt, %6, %7 : vector<2x64xi32>
    %cst = arith.constant dense<0.000000e+00> : vector<2x64xf32>
    %9 = tpu.matmul %5, %0, %cst {dimension_numbers = #tpu.dot_dimension_numbers<[1], [0], [0], [1], [0, 0, 1, 1], [], []>} : vector<2x64xf32>, vector<64x64xf32>, vector<2x64xf32> -> vector<2x64xf32>
    %c0_6 = arith.constant 0 : index
    %c0_7 = arith.constant 0 : index
    %10 = vector.load %arg2[%c0_6, %c0_7] : memref<18x64xf32, #tpu.memory_space<vmem>>, vector<2x64xf32>
    %11 = arith.addf %9, %10 : vector<2x64xf32>
    %12 = math.tanh %11 : vector<2x64xf32>
    %13 = arith.select %8, %12, %5 : vector<2x64xi1>, vector<2x64xf32>
    %cst_8 = arith.constant dense<0.000000e+00> : vector<2x64xf32>
    %14 = tpu.matmul %13, %0, %cst_8 {dimension_numbers = #tpu.dot_dimension_numbers<[1], [0], [0], [1], [0, 0, 1, 1], [], []>} : vector<2x64xf32>, vector<64x64xf32>, vector<2x64xf32> -> vector<2x64xf32>
    %c2 = arith.constant 2 : index
    %c0_9 = arith.constant 0 : index
    %15 = vector.load %arg2[%c2, %c0_9] : memref<18x64xf32, #tpu.memory_space<vmem>>, vector<2x64xf32>
    %16 = arith.addf %14, %15 : vector<2x64xf32>
    %17 = math.tanh %16 : vector<2x64xf32>
    %18 = vector.extract_strided_slice %17 {offsets = [0, 32], sizes = [2, 32], strides = [1, 1]} : vector<2x64xf32> to vector<2x32xf32>
    %c0_10 = arith.constant 0 : index
    %c0_11 = arith.constant 0 : index
    %19 = vector.load %arg8[%c0_10, %c0_11] : memref<16x32xf32, #tpu.memory_space<vmem>>, vector<2x32xf32>
    tpu.vector_store %arg8[%c0_10, %c0_11], %18 {strides = array<i32>} : memref<16x32xf32, #tpu.memory_space<vmem>>, vector<2x32xf32>,
    %cst_12 = arith.constant dense<0.000000e+00> : vector<2x64xf32>
    %20 = tpu.matmul %17, %0, %cst_12 {dimension_numbers = #tpu.dot_dimension_numbers<[1], [0], [0], [1], [0, 0, 1, 1], [], []>} : vector<2x64xf32>, vector<64x64xf32>, vector<2x64xf32> -> vector<2x64xf32>
    %c4 = arith.constant 4 : index
    %c0_13 = arith.constant 0 : index
    %21 = vector.load %arg2[%c4, %c0_13] : memref<18x64xf32, #tpu.memory_space<vmem>>, vector<2x64xf32>
    %22 = arith.addf %20, %21 : vector<2x64xf32>
    %23 = math.tanh %22 : vector<2x64xf32>
    %24 = vector.extract_strided_slice %23 {offsets = [0, 32], sizes = [2, 32], strides = [1, 1]} : vector<2x64xf32> to vector<2x32xf32>
    %c2_14 = arith.constant 2 : index
    %c0_15 = arith.constant 0 : index
    %25 = vector.load %arg8[%c2_14, %c0_15] : memref<16x32xf32, #tpu.memory_space<vmem>>, vector<2x32xf32>
    tpu.vector_store %arg8[%c2_14, %c0_15], %24 {strides = array<i32>} : memref<16x32xf32, #tpu.memory_space<vmem>>, vector<2x32xf32>,
    %cst_16 = arith.constant dense<0.000000e+00> : vector<2x64xf32>
    %26 = tpu.matmul %23, %0, %cst_16 {dimension_numbers = #tpu.dot_dimension_numbers<[1], [0], [0], [1], [0, 0, 1, 1], [], []>} : vector<2x64xf32>, vector<64x64xf32>, vector<2x64xf32> -> vector<2x64xf32>
    %c6 = arith.constant 6 : index
    %c0_17 = arith.constant 0 : index
    %27 = vector.load %arg2[%c6, %c0_17] : memref<18x64xf32, #tpu.memory_space<vmem>>, vector<2x64xf32>
    %28 = arith.addf %26, %27 : vector<2x64xf32>
    %29 = math.tanh %28 : vector<2x64xf32>
    %30 = vector.extract_strided_slice %29 {offsets = [0, 32], sizes = [2, 32], strides = [1, 1]} : vector<2x64xf32> to vector<2x32xf32>
    %c4_18 = arith.constant 4 : index
    %c0_19 = arith.constant 0 : index
    %31 = vector.load %arg8[%c4_18, %c0_19] : memref<16x32xf32, #tpu.memory_space<vmem>>, vector<2x32xf32>
    tpu.vector_store %arg8[%c4_18, %c0_19], %30 {strides = array<i32>} : memref<16x32xf32, #tpu.memory_space<vmem>>, vector<2x32xf32>,
    %cst_20 = arith.constant dense<0.000000e+00> : vector<2x64xf32>
    %32 = tpu.matmul %29, %0, %cst_20 {dimension_numbers = #tpu.dot_dimension_numbers<[1], [0], [0], [1], [0, 0, 1, 1], [], []>} : vector<2x64xf32>, vector<64x64xf32>, vector<2x64xf32> -> vector<2x64xf32>
    %c8 = arith.constant 8 : index
    %c0_21 = arith.constant 0 : index
    %33 = vector.load %arg2[%c8, %c0_21] : memref<18x64xf32, #tpu.memory_space<vmem>>, vector<2x64xf32>
    %34 = arith.addf %32, %33 : vector<2x64xf32>
    %35 = math.tanh %34 : vector<2x64xf32>
    %36 = vector.extract_strided_slice %35 {offsets = [0, 32], sizes = [2, 32], strides = [1, 1]} : vector<2x64xf32> to vector<2x32xf32>
    %c6_22 = arith.constant 6 : index
    %c0_23 = arith.constant 0 : index
    %37 = vector.load %arg8[%c6_22, %c0_23] : memref<16x32xf32, #tpu.memory_space<vmem>>, vector<2x32xf32>
    tpu.vector_store %arg8[%c6_22, %c0_23], %36 {strides = array<i32>} : memref<16x32xf32, #tpu.memory_space<vmem>>, vector<2x32xf32>,
    %cst_24 = arith.constant dense<0.000000e+00> : vector<2x64xf32>
    %38 = tpu.matmul %35, %0, %cst_24 {dimension_numbers = #tpu.dot_dimension_numbers<[1], [0], [0], [1], [0, 0, 1, 1], [], []>} : vector<2x64xf32>, vector<64x64xf32>, vector<2x64xf32> -> vector<2x64xf32>
    %c10 = arith.constant 10 : index
    %c0_25 = arith.constant 0 : index
    %39 = vector.load %arg2[%c10, %c0_25] : memref<18x64xf32, #tpu.memory_space<vmem>>, vector<2x64xf32>
    %40 = arith.addf %38, %39 : vector<2x64xf32>
    %41 = math.tanh %40 : vector<2x64xf32>
    %42 = vector.extract_strided_slice %41 {offsets = [0, 32], sizes = [2, 32], strides = [1, 1]} : vector<2x64xf32> to vector<2x32xf32>
    %c8_26 = arith.constant 8 : index
    %c0_27 = arith.constant 0 : index
    %43 = vector.load %arg8[%c8_26, %c0_27] : memref<16x32xf32, #tpu.memory_space<vmem>>, vector<2x32xf32>
    tpu.vector_store %arg8[%c8_26, %c0_27], %42 {strides = array<i32>} : memref<16x32xf32, #tpu.memory_space<vmem>>, vector<2x32xf32>,
    %cst_28 = arith.constant dense<0.000000e+00> : vector<2x64xf32>
    %44 = tpu.matmul %41, %0, %cst_28 {dimension_numbers = #tpu.dot_dimension_numbers<[1], [0], [0], [1], [0, 0, 1, 1], [], []>} : vector<2x64xf32>, vector<64x64xf32>, vector<2x64xf32> -> vector<2x64xf32>
    %c12 = arith.constant 12 : index
    %c0_29 = arith.constant 0 : index
    %45 = vector.load %arg2[%c12, %c0_29] : memref<18x64xf32, #tpu.memory_space<vmem>>, vector<2x64xf32>
    %46 = arith.addf %44, %45 : vector<2x64xf32>
    %47 = math.tanh %46 : vector<2x64xf32>
    %48 = vector.extract_strided_slice %47 {offsets = [0, 32], sizes = [2, 32], strides = [1, 1]} : vector<2x64xf32> to vector<2x32xf32>
    %c10_30 = arith.constant 10 : index
    %c0_31 = arith.constant 0 : index
    %49 = vector.load %arg8[%c10_30, %c0_31] : memref<16x32xf32, #tpu.memory_space<vmem>>, vector<2x32xf32>
    tpu.vector_store %arg8[%c10_30, %c0_31], %48 {strides = array<i32>} : memref<16x32xf32, #tpu.memory_space<vmem>>, vector<2x32xf32>,
    %cst_32 = arith.constant dense<0.000000e+00> : vector<2x64xf32>
    %50 = tpu.matmul %47, %0, %cst_32 {dimension_numbers = #tpu.dot_dimension_numbers<[1], [0], [0], [1], [0, 0, 1, 1], [], []>} : vector<2x64xf32>, vector<64x64xf32>, vector<2x64xf32> -> vector<2x64xf32>
    %c14 = arith.constant 14 : index
    %c0_33 = arith.constant 0 : index
    %51 = vector.load %arg2[%c14, %c0_33] : memref<18x64xf32, #tpu.memory_space<vmem>>, vector<2x64xf32>
    %52 = arith.addf %50, %51 : vector<2x64xf32>
    %53 = math.tanh %52 : vector<2x64xf32>
    %54 = vector.extract_strided_slice %53 {offsets = [0, 32], sizes = [2, 32], strides = [1, 1]} : vector<2x64xf32> to vector<2x32xf32>
    %c12_34 = arith.constant 12 : index
    %c0_35 = arith.constant 0 : index
    %55 = vector.load %arg8[%c12_34, %c0_35] : memref<16x32xf32, #tpu.memory_space<vmem>>, vector<2x32xf32>
    tpu.vector_store %arg8[%c12_34, %c0_35], %54 {strides = array<i32>} : memref<16x32xf32, #tpu.memory_space<vmem>>, vector<2x32xf32>,
    %56 = vector.extract_strided_slice %53 {offsets = [0, 0], sizes = [2, 32], strides = [1, 1]} : vector<2x64xf32> to vector<2x32xf32>
    %cst_36 = arith.constant dense<0.000000e+00> : vector<2x64xf32>
    %57 = tpu.matmul %53, %0, %cst_36 {dimension_numbers = #tpu.dot_dimension_numbers<[1], [0], [0], [1], [0, 0, 1, 1], [], []>} : vector<2x64xf32>, vector<64x64xf32>, vector<2x64xf32> -> vector<2x64xf32>
    %c16 = arith.constant 16 : index
    %c0_37 = arith.constant 0 : index
    %58 = vector.load %arg2[%c16, %c0_37] : memref<18x64xf32, #tpu.memory_space<vmem>>, vector<2x64xf32>
    %59 = arith.addf %57, %58 : vector<2x64xf32>
    %60 = math.tanh %59 : vector<2x64xf32>
    %61 = vector.extract_strided_slice %60 {offsets = [0, 32], sizes = [2, 32], strides = [1, 1]} : vector<2x64xf32> to vector<2x32xf32>
    %c14_38 = arith.constant 14 : index
    %c0_39 = arith.constant 0 : index
    %62 = vector.load %arg8[%c14_38, %c0_39] : memref<16x32xf32, #tpu.memory_space<vmem>>, vector<2x32xf32>
    tpu.vector_store %arg8[%c14_38, %c0_39], %61 {strides = array<i32>} : memref<16x32xf32, #tpu.memory_space<vmem>>, vector<2x32xf32>,
    %c0_40 = arith.constant 0 : index
    %c0_41 = arith.constant 0 : index
    %c0_42 = arith.constant 0 : index
    %63 = vector.load %arg7[%c0_40, %c0_41, %c0_42] : memref<2x2x32xf32, #tpu.memory_space<vmem>>, vector<1x2x32xf32>
    %64 = vector.shape_cast %63 : vector<1x2x32xf32> to vector<2x32xf32>
    %65 = vector.shape_cast %56 : vector<2x32xf32> to vector<1x2x32xf32>
    tpu.vector_store %arg7[%c0_40, %c0_41, %c0_42], %65 {strides = array<i32>} : memref<2x2x32xf32, #tpu.memory_space<vmem>>, vector<1x2x32xf32>,
    %66 = vector.extract_strided_slice %60 {offsets = [0, 32], sizes = [2, 32], strides = [1, 1]} : vector<2x64xf32> to vector<2x32xf32>
    %c1_43 = arith.constant 1 : index
    %c0_44 = arith.constant 0 : index
    %c0_45 = arith.constant 0 : index
    %67 = vector.load %arg7[%c1_43, %c0_44, %c0_45] : memref<2x2x32xf32, #tpu.memory_space<vmem>>, vector<1x2x32xf32>
    %68 = vector.shape_cast %67 : vector<1x2x32xf32> to vector<2x32xf32>
    %69 = vector.shape_cast %66 : vector<2x32xf32> to vector<1x2x32xf32>
    tpu.vector_store %arg7[%c1_43, %c0_44, %c0_45], %69 {strides = array<i32>} : memref<2x2x32xf32, #tpu.memory_space<vmem>>, vector<1x2x32xf32>,
    %c0_46 = arith.constant 0 : index
    %c0_47 = arith.constant 0 : index
    %70 = vector.load %arg8[%c0_46, %c0_47] : memref<16x32xf32, #tpu.memory_space<vmem>>, vector<16x32xf32>
    %c0_48 = arith.constant 0 : index
    %c0_49 = arith.constant 0 : index
    %71 = vector.load %arg4[%c0_48, %c0_49] : memref<32x128xf32, #tpu.memory_space<vmem>>, vector<32x128xf32>
    %cst_50 = arith.constant dense<0.000000e+00> : vector<16x128xf32>
    %72 = tpu.matmul %70, %71, %cst_50 {dimension_numbers = #tpu.dot_dimension_numbers<[1], [0], [0], [1], [0, 0, 1, 1], [], []>} : vector<16x32xf32>, vector<32x128xf32>, vector<16x128xf32> -> vector<16x128xf32>
    %c0_51 = arith.constant 0 : index
    %c0_52 = arith.constant 0 : index
    %73 = vector.load %arg5[%c0_51, %c0_52] : memref<1x128xf32, #tpu.memory_space<vmem>>, vector<1x128xf32>
    %74 = vector.broadcast %73 : vector<1x128xf32> to vector<16x128xf32>
    %75 = arith.addf %72, %74 : vector<16x128xf32>
    %c0_53 = arith.constant 0 : index
    %c0_54 = arith.constant 0 : index
    %76 = vector.load %arg6[%c0_53, %c0_54] : memref<16x128xf32, #tpu.memory_space<vmem>>, vector<16x128xf32>
    tpu.vector_store %arg6[%c0_53, %c0_54], %75 {strides = array<i32>} : memref<16x128xf32, #tpu.memory_space<vmem>>, vector<16x128xf32>,
    return
  }
  func.func @transform_0(%arg0: i32) -> (i32, i32, i32) {
    %c0_i32 = arith.constant 0 : i32
    %c0_i32_0 = arith.constant 0 : i32
    %c0_i32_1 = arith.constant 0 : i32
    %c0_i32_2 = arith.constant 0 : i32
    return %c0_i32, %c0_i32_0, %c0_i32_1 : i32, i32, i32
  }
  func.func @transform_1(%arg0: i32) -> (i32, i32) {
    %c0_i32 = arith.constant 0 : i32
    %c0_i32_0 = arith.constant 0 : i32
    %c0_i32_1 = arith.constant 0 : i32
    return %c0_i32, %c0_i32_0 : i32, i32
  }
  func.func @transform_2(%arg0: i32) -> (i32, i32) {
    %c0_i32 = arith.constant 0 : i32
    %c0_i32_0 = arith.constant 0 : i32
    %c0_i32_1 = arith.constant 0 : i32
    return %c0_i32, %c0_i32_0 : i32, i32
  }
  func.func @transform_3(%arg0: i32) -> (i32, i32) {
    %c0_i32 = arith.constant 0 : i32
    %c0_i32_0 = arith.constant 0 : i32
    %c0_i32_1 = arith.constant 0 : i32
    return %c0_i32, %c0_i32_0 : i32, i32
  }
  func.func @transform_4(%arg0: i32) -> (i32, i32) {
    %c0_i32 = arith.constant 0 : i32
    %c0_i32_0 = arith.constant 0 : i32
    %c0_i32_1 = arith.constant 0 : i32
    return %c0_i32, %c0_i32_0 : i32, i32
  }
  func.func @transform_5(%arg0: i32) -> (i32, i32) {
    %c0_i32 = arith.constant 0 : i32
    %c0_i32_0 = arith.constant 0 : i32
    %c0_i32_1 = arith.constant 0 : i32
    return %c0_i32, %c0_i32_0 : i32, i32
  }
  func.func @transform_6(%arg0: i32) -> (i32, i32, i32) {
    %c0_i32 = arith.constant 0 : i32
    %c0_i32_0 = arith.constant 0 : i32
    %c0_i32_1 = arith.constant 0 : i32
    %c0_i32_2 = arith.constant 0 : i32
    return %c0_i32, %c0_i32_0, %c0_i32_1 : i32, i32, i32
  }
}

</mosaic_0001>

<bundles_post_ra>
// kernel: rnn_model_forward.1
= control target key start
LH: loop header
LB: loop body
LE: loop exit
PB: predicated region body
PF: predicated region fallthrough
CT: control target
= control target key end

     0   :  { %12 = vsyncpa [#allocation4], 0  ;;  %s475_s27 = smov 32   ;;  %s694_s0 = inlined_call_operand.vmem [shape: f32[2,2,32], index: 0, kind: input, shape index: {}]   ;;  %s695_s1 = inlined_call_operand.vmem [shape: f32[18,64], index: 1, kind: input, shape index: {}]   ;;  %s696_s2 = inlined_call_operand.vmem [shape: f32[64,64], index: 2, kind: input, shape index: {}]   ;;  %s697_s3 = inlined_call_operand.vmem [shape: f32[32,128], index: 3, kind: input, shape index: {}]   ;;  %s698_s4 = inlined_call_operand.vmem [shape: f32[1,128], index: 4, kind: input, shape index: {}]   ;;  %s699_s5 = inlined_call_operand.hbm [shape: f32[16,128], index: 5, kind: output, shape index: {0}]   ;;  %s700_s6 = inlined_call_operand.hbm [shape: f32[2,2,32], index: 6, kind: output, shape index: {1}]  }
   0x1   :  { %v385_v0 = vld [vmem:[%s694_s0 + $0x2] sm:$0x3]  ;;  %v523_v1 = vld [vmem:[%s696_s2 + $0x38] sm:$0xff]  ;;  %v528_v2 = vld [vmem:[%s696_s2 + $0x30] sm:$0xff] }
   0x2   :  { %36 = vrot.lane.b32.xlu0 %v385_v0, %s475_s27  ;;  %57 = vmatpush.msra.mxu0 %v523_v1  ;;  %v535_v3 = vld [vmem:[%s696_s2 + $0x28] sm:$0xff] }
   0x3   :  { %83 = vmatpush.msra.mxu1 %v523_v1  ;;  %113 = vmatpush.msra.mxu2 %v523_v1 }
   0x4   :  { %58 = vmatpush.msra.mxu0 %v528_v2  ;;  %142 = vmatpush.msra.mxu3 %v523_v1 }
   0x5   :  { %13 = vsyncpa [#allocation6], 0  ;;  %v544_v4 = vld [vmem:[%s696_s2 + $0x20] sm:$0xff]  ;;  %84 = vmatpush.msra.mxu1 %v528_v2  ;;  %114 = vmatpush.msra.mxu2 %v528_v2  ;;  %v553_v5 = vld [vmem:[%s696_s2 + $0x18] sm:$0xff]  ;;  %vm39_vm0 = vcmask 261120   ;;  %vm45_vm1 = vcmask 523264   ;;  %v41_v13 = vlaneseq }
   0x6   :  { %59 = vmatpush.msra.mxu0 %v535_v3  ;;  %143 = vmatpush.msra.mxu3 %v528_v2  ;;  %v562_v6 = vld [vmem:[%s696_s2 + $0x10] sm:$0xff]  ;;  %v25_v7 = vld [vmem:[%s696_s2 + $0x8] sm:$0xff]  ;;  %v24_v8 = vld [vmem:[%s696_s2] sm:$0xff]  ;;  %s476_s20 = smov 96   ;;  %vm100_vm3 = vcmask 254976   ;;  %s477_s18 = smov [#allocation5]  }
   0x7   :  { %85 = vmatpush.msra.mxu1 %v535_v3  ;;  %115 = vmatpush.msra.mxu2 %v535_v3  ;;  %v32_v9 = vld [vmem:[%s694_s0] sm:$0x3]  ;;  %v42_v16 = vand.u32 127, %v41_v13  ;;  %v71_v19 = vld [vmem:[%s695_s1 + $0x2] sm:$0x3]  ;;  %v313_v38 = vld [vmem:[%s697_s3 + $0x18] sm:$0xff] }
   0x8   :  { %60 = vmatpush.msra.mxu0 %v544_v4  ;;  %144 = vmatpush.msra.mxu3 %v535_v3  ;;  %v44_v12 = vld [vmem:[%s695_s1] sm:$0x3]  ;;  %v102_v24 = vld [vmem:[%s695_s1 + $0x4] sm:$0x3]  ;;  %v131_v29 = vld [vmem:[%s695_s1 + $0x6] sm:$0x3] }
   0x9   :  { %86 = vmatpush.msra.mxu1 %v544_v4  ;;  %116 = vmatpush.msra.mxu2 %v544_v4  ;;  %vm43_vm2 = vcmp.lt.s32.totalorder %v42_v16, 32  ;;  %v160_v34 = vld [vmem:[%s695_s1 + $0x8] sm:$0x3]  ;;  %v312_v39 = vld [vmem:[%s697_s3 + $0x10] sm:$0xff]  ;;  %v310_v41 = vld [vmem:[%s697_s3] sm:$0xff]  ;;  %s366_s19 = sshll.u32 %s477_s18, 4  ;;  %s367_s19 = int_to_ptr.vmem [resolvable:$true] %s366_s19 }
   0xa   :  { %61 = vmatpush.msra.mxu0 %v553_v5  ;;  %145 = vmatpush.msra.mxu3 %v544_v4  ;;  %v311_v40 = vld [vmem:[%s697_s3 + $0x8] sm:$0xff]  ;;  %v404_v48 = vld [vmem:[%s698_s4] ss:$0 sm:$0xff]  ;;  %v276_v62 = vld [vmem:[%s695_s1 + $0x10] sm:$0x3]  ;;  %s478_s23 = smov 2  }
   0xb   :  { %87 = vmatpush.msra.mxu1 %v553_v5  ;;  %117 = vmatpush.msra.mxu2 %v553_v5  ;;  %v189_v44 = vld [vmem:[%s695_s1 + $0xa] sm:$0x3]  ;;  %v218_v52 = vld [vmem:[%s695_s1 + $0xc] sm:$0x3]  ;;  %v247_v57 = vld [vmem:[%s695_s1 + $0xe] sm:$0x3] }
   0xc   :  { %62 = vmatpush.msra.mxu0 %v562_v6  ;;  %146 = vmatpush.msra.mxu3 %v553_v5  ;;  %s368_s1 = sshll.u32 %s700_s6, 4  ;;  %s355_s28 = sshll.u32 %s699_s5, 4  ;;  %s369_s1 = int_to_ptr.hbm [resolvable:$true] %s368_s1  ;;  %s356_s28 = int_to_ptr.hbm [resolvable:$true] %s355_s28 }
   0xd   :  { %88 = vmatpush.msra.mxu1 %v562_v6  ;;  %118 = vmatpush.msra.mxu2 %v562_v6  ;;  %s480_s29 = smov 128   ;;  %s481_s30 = smov 8  }
   0xe   :  { %63 = vmatpush.msra.mxu0 %v25_v7  ;;  %147 = vmatpush.msra.mxu3 %v562_v6 }
   0xf   :  { %89 = vmatpush.msra.mxu1 %v25_v7  ;;  %119 = vmatpush.msra.mxu2 %v25_v7 }
  0x10   :  { %148 = vmatpush.msra.mxu3 %v25_v7  ;;  %64 = vmatpush.msra.mxu0 %v24_v8 }
  0x11   :  { %90 = vmatpush.msra.mxu1 %v24_v8  ;;  %120 = vmatpush.msra.mxu2 %v24_v8 }
  0x12   :  { %149 = vmatpush.msra.mxu3 %v24_v8  ;;  %171 = vmatpush.msrb.mxu0 %v523_v1 }
  0x13   :  { %200 = vmatpush.msrb.mxu1 %v523_v1  ;;  %229 = vmatpush.msrb.mxu2 %v523_v1 }
  0x14   :  { %258 = vmatpush.msrb.mxu3 %v523_v1  ;;  %172 = vmatpush.msrb.mxu0 %v528_v2 }
  0x15   :  { %201 = vmatpush.msrb.mxu1 %v528_v2  ;;  %230 = vmatpush.msrb.mxu2 %v528_v2 }
  0x16   :  { %259 = vmatpush.msrb.mxu3 %v528_v2  ;;  %173 = vmatpush.msrb.mxu0 %v535_v3 }
  0x17   :  { %202 = vmatpush.msrb.mxu1 %v535_v3  ;;  %231 = vmatpush.msrb.mxu2 %v535_v3 }
  0x18   :  { %260 = vmatpush.msrb.mxu3 %v535_v3  ;;  %174 = vmatpush.msrb.mxu0 %v544_v4 }
  0x19   :  { %203 = vmatpush.msrb.mxu1 %v544_v4  ;;  %232 = vmatpush.msrb.mxu2 %v544_v4 }
  0x1a   :  { %261 = vmatpush.msrb.mxu3 %v544_v4  ;;  %175 = vmatpush.msrb.mxu0 %v553_v5 }
  0x1b   :  { %204 = vmatpush.msrb.mxu1 %v553_v5  ;;  %233 = vmatpush.msrb.mxu2 %v553_v5 }
  0x1c   :  { %262 = vmatpush.msrb.mxu3 %v553_v5  ;;  %176 = vmatpush.msrb.mxu0 %v562_v6 }
  0x1d   :  { %205 = vmatpush.msrb.mxu1 %v562_v6  ;;  %234 = vmatpush.msrb.mxu2 %v562_v6 }
  0x1e   :  { %263 = vmatpush.msrb.mxu3 %v562_v6  ;;  %177 = vmatpush.msrb.mxu0 %v25_v7 }
  0x1f   :  { %206 = vmatpush.msrb.mxu1 %v25_v7  ;;  %235 = vmatpush.msrb.mxu2 %v25_v7 }
  0x20   :  { %264 = vmatpush.msrb.mxu3 %v25_v7  ;;  %178 = vmatpush.msrb.mxu0 %v24_v8 }
  0x21   :  { %207 = vmatpush.msrb.mxu1 %v24_v8  ;;  %236 = vmatpush.msrb.mxu2 %v24_v8 }
  0x22   :  { %265 = vmatpush.msrb.mxu3 %v24_v8 }
  0x74   :  { %v37_v10 = vpop.permute.xlu0 %36 }
  0x75   :  { %v40_v11 = vsel %vm39_vm0, %v32_v9, %v37_v10 }
  0x76   :  { %386 = vmatmul.msk.f32.vlgmr.msra.gmra.mxu0 %vm45_vm1, %v40_v11 }
  0x77   :  { %287 = vmatpush.msra.mxu0 %v523_v1 }
  0x79   :  { %288 = vmatpush.msra.mxu0 %v528_v2 }
  0x7b   :  { %289 = vmatpush.msra.mxu0 %v535_v3 }
  0x7d   :  { %290 = vmatpush.msra.mxu0 %v544_v4 }
  0x7f   :  { %291 = vmatpush.msra.mxu0 %v553_v5 }
  0x81   :  { %292 = vmatpush.msra.mxu0 %v562_v6 }
  0x83   :  { %293 = vmatpush.msra.mxu0 %v25_v7 }
  0x85   :  { %294 = vmatpush.msra.mxu0 %v24_v8 }
  0xf3   :  { %v66_v14 = vpop.f32.mrf.mxu0 }
  0xf4   :  { %v67_v15 = vadd.f32 %v66_v14, %v44_v12 }
  0xf6   :  { %405 = vtanh.f32 %v67_v15 }
  0xfc   :  { %v406_v17 = vpop.eup %405 }
  0xfd   :  { %v70_v18 = vsel %vm43_vm2, %v406_v17, %v40_v11 }
  0xfe   :  { %387 = vmatmul.msk.f32.vlgmr.msra.gmra.mxu1 %vm45_vm1, %v70_v18 }
  0xff   :  { %336 = vmatpush.msra.mxu1 %v313_v38 }
 0x101   :  { %337 = vmatpush.msra.mxu1 %v312_v39 }
 0x103   :  { %338 = vmatpush.msra.mxu1 %v311_v40 }
 0x105   :  { %339 = vmatpush.msra.mxu1 %v310_v41 }
 0x17b   :  { %v92_v20 = vpop.f32.mrf.mxu1 }
 0x17c   :  { %v93_v21 = vadd.f32 %v92_v20, %v71_v19 }
 0x17e   :  { %407 = vtanh.f32 %v93_v21 }
 0x184   :  { %v408_v22 = vpop.eup %407 }
 0x185   :  { %97 = vrot.lane.b32.xlu0 %v408_v22, %s476_s20  ;;  %388 = vmatmul.msk.f32.vlgmr.msra.gmra.mxu2 %vm45_vm1, %v408_v22 }
 0x1f7   :  { %v98_v23 = vpop.permute.xlu0 %97 }
 0x1f8   :  { %101 = vst.msk [vmem:[#allocation2] sm:$0x3] %vm100_vm3, %v98_v23 }
 0x208   :  { %v122_v25 = vpop.f32.mrf.mxu2 }
 0x209   :  { %v123_v26 = vadd.f32 %v122_v25, %v102_v24 }
 0x20b   :  { %409 = vtanh.f32 %v123_v26 }
 0x211   :  { %v410_v27 = vpop.eup %409 }
 0x212   :  { %127 = vrot.lane.b32.xlu1 %v410_v27, %s476_s20  ;;  %389 = vmatmul.msk.f32.vlgmr.msra.gmra.mxu3 %vm45_vm1, %v410_v27 }
 0x284   :  { %v128_v28 = vpop.permute.xlu1 %127 }
 0x285   :  { %130 = vst.msk [vmem:[#allocation2 + $0x2] sm:$0x3] %vm100_vm3, %v128_v28 }
 0x295   :  { %v151_v30 = vpop.f32.mrf.mxu3 }
 0x296   :  { %v152_v31 = vadd.f32 %v151_v30, %v131_v29 }
 0x298   :  { %411 = vtanh.f32 %v152_v31 }
 0x29e   :  { %v412_v32 = vpop.eup %411 }
 0x29f   :  { %156 = vrot.lane.b32.xlu1 %v412_v32, %s476_s20  ;;  %390 = vmatmul.msk.f32.vlgmr.msrb.gmra.mxu0 %vm45_vm1, %v412_v32 }
 0x311   :  { %v157_v33 = vpop.permute.xlu1 %156 }
 0x312   :  { %159 = vst.msk [vmem:[#allocation2 + $0x4] sm:$0x3] %vm100_vm3, %v157_v33 }
 0x31c   :  { %v180_v35 = vpop.f32.mrf.mxu0 }
 0x31d   :  { %v181_v36 = vadd.f32 %v180_v35, %v160_v34 }
 0x31f   :  { %413 = vtanh.f32 %v181_v36 }
 0x325   :  { %v414_v37 = vpop.eup %413 }
 0x326   :  { %185 = vrot.lane.b32.xlu2 %v414_v37, %s476_s20  ;;  %391 = vmatmul.msk.f32.vlgmr.msrb.gmra.mxu1 %vm45_vm1, %v414_v37 }
 0x380   :  { %v186_v42 = vpop.permute.xlu2 %185 }
 0x381   :  { %188 = vst.msk [vmem:[#allocation2 + $0x6] sm:$0x3] %vm100_vm3, %v186_v42 }
 0x388   :  { %v308_v43 = vld [vmem:[#allocation2] sm:$0xff] }
 0x389   :  { %395 = vmatmul.msk.f32.vlgmr.msra.gmra.mxu1 %vm39_vm0, %v308_v43 }
 0x3a3   :  { %v209_v45 = vpop.f32.mrf.mxu1 }
 0x3a4   :  { %v210_v46 = vadd.f32 %v209_v45, %v189_v44 }
 0x3a6   :  { %415 = vtanh.f32 %v210_v46 }
 0x3ac   :  { %v416_v47 = vpop.eup %415 }
 0x3ad   :  { %214 = vrot.lane.b32.xlu2 %v416_v47, %s476_s20  ;;  %392 = vmatmul.msk.f32.vlgmr.msrb.gmra.mxu2 %vm45_vm1, %v416_v47 }
 0x406   :  { %v341_v49 = vpop.f32.mrf.mxu1 }
 0x407   :  { %v342_v50 = vadd.f32 %v404_v48, %v341_v49  ;;  %v215_v51 = vpop.permute.xlu2 %214 }
 0x408   :  { %217 = vst.msk [vmem:[#allocation2 + $0x8] sm:$0x3] %vm100_vm3, %v215_v51 }
 0x409   :  { %347 = vst [vmem:[#allocation3] sm:$0xff] %v342_v50 }
 0x430   :  { %v238_v53 = vpop.f32.mrf.mxu2 }
 0x431   :  { %v239_v54 = vadd.f32 %v238_v53, %v218_v52 }
 0x433   :  { %417 = vtanh.f32 %v239_v54 }
 0x439   :  { %v418_v55 = vpop.eup %417 }
 0x43a   :  { %243 = vrot.lane.b32.xlu0 %v418_v55, %s476_s20  ;;  %393 = vmatmul.msk.f32.vlgmr.msrb.gmra.mxu3 %vm45_vm1, %v418_v55 }
 0x4ac   :  { %v244_v56 = vpop.permute.xlu0 %243 }
 0x4ad   :  { %246 = vst.msk [vmem:[#allocation2 + $0xa] sm:$0x3] %vm100_vm3, %v244_v56 }
 0x4bd   :  { %v267_v58 = vpop.f32.mrf.mxu3 }
 0x4be   :  { %v268_v59 = vadd.f32 %v267_v58, %v247_v57 }
 0x4c0   :  { %419 = vtanh.f32 %v268_v59 }
 0x4c6   :  { %v420_v60 = vpop.eup %419 }
 0x4c7   :  { %305 = vst.msk [vmem:[#allocation5] sm:$0x3] %vm100_vm3, %v420_v60  ;;  %272 = vrot.lane.b32.xlu1 %v420_v60, %s476_s20  ;;  %394 = vmatmul.msk.f32.vlgmr.msra.gmra.mxu0 %vm45_vm1, %v420_v60 }
 0x539   :  { %v273_v61 = vpop.permute.xlu1 %272 }
 0x53a   :  { %275 = vst.msk [vmem:[#allocation2 + $0xc] sm:$0x3] %vm100_vm3, %v273_v61 }
 0x544   :  { %v296_v63 = vpop.f32.mrf.mxu0 }
 0x545   :  { %v297_v0 = vadd.f32 %v296_v63, %v276_v62 }
 0x547   :  { %421 = vtanh.f32 %v297_v0 }
 0x54d   :  { %v422_v1 = vpop.eup %421 }
 0x54e   :  { %301 = vrot.lane.b32.xlu2 %v422_v1, %s476_s20  ;;  %s479_s20 = smov [#allocation3]  }
 0x54f   :  { %s353_s24 = sshll.u32 %s479_s20, 4  ;;  %s354_s24 = int_to_ptr.vmem [resolvable:$true] %s353_s24 }
 0x5a8   :  { %v302_v2 = vpop.permute.xlu2 %301 }
 0x5a9   :  { %304 = vst.msk [vmem:[#allocation2 + $0xe] sm:$0x3] %vm100_vm3, %v302_v2 }
 0x5aa   :  { %307 = vst.msk [vmem:[#allocation5 + $0x2] sm:$0x3] %vm100_vm3, %v302_v2 }
 0x5ab   :  { %374 = dma.vmem_to_hbm [thread:$0]  %s367_s19, 64, %s369_s1, [#allocation6], %s475_s27, %s475_s27, %s478_s23  }
 0x5b0   :  { %v309_v3 = vld [vmem:[#allocation2 + $0x8] sm:$0xff] }
 0x5b1   :  { %396 = vmatmul.msk.f32.gmra.mxu1 %vm39_vm0, %v309_v3 }
 0x62e   :  { %v344_v4 = vpop.f32.mrf.mxu1 }
 0x62f   :  { %v345_v5 = vadd.f32 %v404_v48, %v344_v4 }
 0x631   :  { %348 = vst [vmem:[#allocation3 + $0x8] sm:$0xff] %v345_v5 }
 0x632   :  { %361 = dma.vmem_to_hbm [thread:$0]  %s354_s24, 256, %s356_s28, [#allocation4], %s480_s29, %s480_s29, %s481_s30  }
 0x633   :  { %471 = dma.done.wait [#allocation4], 256  }
 0x634   :  { %472 = vsyncadd [#allocation4], 4294967040 }
 0x635   :  { %473 = dma.done.wait [#allocation6], 64  }
 0x636   :  { %474 = vsyncadd [#allocation6], 4294967232 }
 0x637   :  { %383 = vsyncpa [#allocation4], 1 }
 0x638   :  { %384 = vsyncpa [#allocation6], 1 }

</bundles_post_ra>
